<compile_context>
chip_gen: v5e
topology: v5e:2x2
jax: 0.10.0
libtpu: 0.0.40
codegen_flags: <defaults>
</compile_context>

<pallas_src>
import math
from functools import partial

import jax
import jax.numpy as jnp
from jax.experimental import pallas as pl
from jax.experimental.pallas import tpu as pltpu


def _round_up(x, m):
    return (x + m - 1) // m * m


# ----------------------------------------------------------------------------
# Fused kernel: full encoder (Linear+LeakyReLU)* then decoder (Linear)*.
# Ref order: x, W_0..W_{L-1}, b_0..b_{L-1}, out, hidden  (L = n_enc + n_dec,
# encoder layers first). Activations never leave VMEM/registers; every layer
# uses its own 128-padded (din, dout).
# ----------------------------------------------------------------------------
def _stackdae_kernel(*refs, n_enc, n_dec, slope):
    n_layers = n_enc + n_dec
    x_ref = refs[0]
    w_refs = refs[1:1 + n_layers]
    b_refs = refs[1 + n_layers:1 + 2 * n_layers]
    out_ref = refs[1 + 2 * n_layers]
    hid_ref = refs[2 + 2 * n_layers]

    cdt = w_refs[0].dtype if n_layers else x_ref.dtype   # bf16 MXU dtype
    h = x_ref[...]                        # (TM, pad(in_dim)) in compute dtype
    hf = h.astype(jnp.float32)

    if n_enc == 0:
        hid_ref[...] = hf.astype(hid_ref.dtype)

    # ---- encoder: Linear + bias + LeakyReLU (f32 epilogue on the VPU) ----
    # TODO(synk): for very deep / very wide stacks whose bf16 weights approach
    # the v7x 64 MiB/TC VMEM budget, add a weight-streaming path
    # (memory_space=pl.ANY + make_async_copy double-buffer per layer) and a
    # lax.fori_loop over a uniformly-bucketed weight stack.
    for i in range(n_enc):                # static unroll (few layers)
        z = jnp.dot(h, w_refs[i][...], preferred_element_type=jnp.float32)
        z = z + b_refs[i][...]            # f32 bias
        zf = jnp.maximum(z, slope * z)    # LeakyReLU, single VPU max
        if i == n_enc - 1:
            hid_ref[...] = zf.astype(hid_ref.dtype)
        h = zf.astype(cdt)
        hf = zf

    # ---- decoder: Linear + bias only ----
    yf = hf
    for j in range(n_dec):
        i = n_enc + j
        yf = jnp.dot(h, w_refs[i][...], preferred_element_type=jnp.float32)
        yf = yf + b_refs[i][...]
        h = yf.astype(cdt)

    out_ref[...] = yf.astype(out_ref.dtype)


# ----------------------------------------------------------------------------
# One-time parameter preparation (hoisted out of the per-call path).
# ----------------------------------------------------------------------------
def prepare_stackdae_params(enc_params, dec_params, compute_dtype=jnp.bfloat16):
    """Zero-pad each layer to its own 128-multiples and cast weights to bf16.

    Padding lanes provably stay zero through Linear (+0 bias) and
    LeakyReLU(0)=0, so the padded stack chains exactly; the wrapper slices the
    padding off the outputs.
    """
    def pad_layer(w, b):
        din, dout = w.shape
        dpi, dpo = _round_up(din, 128), _round_up(dout, 128)
        wp = jnp.zeros((dpi, dpo), jnp.float32).at[:din, :dout].set(
            w.astype(jnp.float32)).astype(compute_dtype)
        bp = jnp.zeros((1, dpo), jnp.float32).at[0, :dout].set(
            b.astype(jnp.float32))
        return wp, bp

    enc_w, enc_b, dec_w, dec_b = [], [], [], []
    for w, b in enc_params:
        wp, bp = pad_layer(w, b)
        enc_w.append(wp)
        enc_b.append(bp)
    for w, b in dec_params:
        wp, bp = pad_layer(w, b)
        dec_w.append(wp)
        dec_b.append(bp)

    in_dim = enc_params[0][0].shape[0] if enc_params else (
        dec_params[0][0].shape[0] if dec_params else 0)
    hidden_dim = enc_params[-1][0].shape[1] if enc_params else in_dim
    out_dim = dec_params[-1][0].shape[1] if dec_params else hidden_dim
    dims = (in_dim, hidden_dim, out_dim)
    return tuple(enc_w), tuple(enc_b), tuple(dec_w), tuple(dec_b), dims


def _default_block_batch():
    # v7x has 64 MiB VMEM/TC -> keep batch tiles <= 256 after resident weights;
    # v5e/v6e (128 MiB) have room for 512-row tiles.
    try:
        kind = jax.devices()[0].device_kind.lower()
    except Exception:
        return 256
    return 256 if "v7" in kind else 512


# ----------------------------------------------------------------------------
# Jitted forward: one pallas_call for the whole encoder+decoder stack.
# ----------------------------------------------------------------------------
@partial(jax.jit, static_argnames=("dims", "block_batch"))
def _stackdae_apply(x, enc_w, enc_b, dec_w, dec_b, *, dims, block_batch):
    B = x.shape[0]
    in_dim, hidden_dim, out_dim = dims
    n_enc, n_dec = len(enc_w), len(dec_w)
    n_layers = n_enc + n_dec
    all_w = tuple(enc_w) + tuple(dec_w)
    all_b = tuple(enc_b) + tuple(dec_b)
    cdt = all_w[0].dtype if n_layers else jnp.bfloat16

    din_pad = _round_up(in_dim, 128)
    hid_pad = _round_up(hidden_dim, 128)
    out_w_pad = _round_up(out_dim, 128)

    # Batch tiling: TM multiple of 16 (bf16 packs (16,128) per vreg); aim for
    # >=2 grid programs so both v7x TensorCores get work; cap by block_batch.
    num_tiles = max(2 if B > 16 else 1, pl.cdiv(B, block_batch))
    TM = min(_round_up(pl.cdiv(B, num_tiles), 16), block_batch)
    B_pad = _round_up(B, TM)
    grid = (B_pad // TM,)

    x_pad = jnp.zeros((B_pad, din_pad), cdt).at[:B, :in_dim].set(x.astype(cdt))

    # VMEM budget: single-buffered weights/biases + double-buffered x tile and
    # the two f32 output tiles + slack for f32 intermediates.
    weight_bytes = sum(int(w.size) * w.dtype.itemsize for w in all_w)
    bias_bytes = sum(int(b.size) * b.dtype.itemsize for b in all_b)
    max_pad = max([din_pad, hid_pad, out_w_pad]
                  + [w.shape[1] for w in all_w]) if n_layers else din_pad
    io_bytes = (2 * TM * din_pad * x_pad.dtype.itemsize
                + 2 * TM * (hid_pad + out_w_pad) * 4)
    act_bytes = 4 * TM * max_pad * 4
    required = weight_bytes + bias_bytes + io_bytes + act_bytes
    vmem_limit = int(min(max(2 * required, 32 << 20), 64 << 20))

    flops = 2 * B_pad * sum(w.shape[0] * w.shape[1] for w in all_w)
    bytes_accessed = (int(x_pad.size) * x_pad.dtype.itemsize
                      + weight_bytes + bias_bytes
                      + B_pad * (hid_pad + out_w_pad) * 4)

    # Grid-invariant blocks -> single buffer (no pointless 2x weight VMEM).
    in_specs = [pl.BlockSpec((TM, din_pad), lambda i: (i, 0))]
    in_specs += [pl.BlockSpec(w.shape, lambda i: (0, 0),
                              pipeline_mode=pl.Buffered(1)) for w in all_w]
    in_specs += [pl.BlockSpec(b.shape, lambda i: (0, 0),
                              pipeline_mode=pl.Buffered(1)) for b in all_b]

    out_full, hid_full = pl.pallas_call(
        partial(_stackdae_kernel, n_enc=n_enc, n_dec=n_dec, slope=0.01),
        out_shape=(jax.ShapeDtypeStruct((B_pad, out_w_pad), jnp.float32),
                   jax.ShapeDtypeStruct((B_pad, hid_pad), jnp.float32)),
        grid=grid,
        in_specs=in_specs,
        out_specs=(pl.BlockSpec((TM, out_w_pad), lambda i: (i, 0)),
                   pl.BlockSpec((TM, hid_pad), lambda i: (i, 0))),
        compiler_params=pltpu.CompilerParams(
            dimension_semantics=("parallel",),
            vmem_limit_bytes=vmem_limit),
        cost_estimate=pl.CostEstimate(
            flops=flops, transcendentals=0, bytes_accessed=bytes_accessed),
    )(x_pad, *all_w, *all_b)

    return out_full[:B, :out_dim], hid_full[:B, :hidden_dim]


def stackdae_forward(x, prepared, *, block_batch=None):
    """Forward pass. `prepared` comes from prepare_stackdae_params (one-time)."""
    enc_w, enc_b, dec_w, dec_b, dims = prepared
    if block_batch is None:
        block_batch = _default_block_batch()
    return _stackdae_apply(x, enc_w, enc_b, dec_w, dec_b,
                           dims=dims, block_batch=block_batch)


# ----------------------------------------------------------------------------
# StackDAE parameter construction (mirrors the PyTorch __init__ dim logic)
# ----------------------------------------------------------------------------
def stackdae_dims(in_dim, out_dim, layer_num):
    stride = (in_dim / out_dim) ** (1.0 / layer_num)
    enc_dims, dec_dims = [], []
    d = float(in_dim)
    for _ in range(layer_num):
        o = d / stride
        enc_dims.append((int(d), int(o)))
        d = d / stride
    for _ in range(layer_num):
        o = d * stride
        dec_dims.append((int(d), int(o)))
        d = d * stride
    return enc_dims, dec_dims


def init_linear_params(key, din, dout, dtype=jnp.float32):
    # Mimics torch.nn.Linear default init: U(-1/sqrt(fan_in), +1/sqrt(fan_in))
    kw, kb = jax.random.split(key)
    bound = 1.0 / math.sqrt(din)
    w = jax.random.uniform(kw, (din, dout), dtype, minval=-bound, maxval=bound)
    b = jax.random.uniform(kb, (dout,), dtype, minval=-bound, maxval=bound)
    return w, b


def init_stackdae_params(key, in_dim, out_dim, layer_num, dtype=jnp.float32):
    enc_dims, dec_dims = stackdae_dims(in_dim, out_dim, layer_num)
    keys = jax.random.split(key, len(enc_dims) + len(dec_dims))
    enc_params = [
        init_linear_params(keys[i], d[0], d[1], dtype)
        for i, d in enumerate(enc_dims)
    ]
    dec_params = [
        init_linear_params(keys[len(enc_dims) + i], d[0], d[1], dtype)
        for i, d in enumerate(dec_dims)
    ]
    return enc_params, dec_params


# ----------------------------------------------------------------------------
# Pure-JAX reference mirroring the kernel's bf16-matmul / f32-accumulate path
# ----------------------------------------------------------------------------
def stackdae_reference(x, enc_params, dec_params, compute_dtype=jnp.bfloat16):
    h = x.astype(jnp.float32)
    for w, b in enc_params:
        z = jnp.dot(h.astype(compute_dtype), w.astype(compute_dtype),
                    preferred_element_type=jnp.float32) + b.astype(jnp.float32)
        h = jnp.maximum(z, 0.01 * z)
    y = h
    for w, b in dec_params:
        y = jnp.dot(y.astype(compute_dtype), w.astype(compute_dtype),
                    preferred_element_type=jnp.float32) + b.astype(jnp.float32)
    return y, h


if __name__ == "__main__":
    # Small shapes consistent with the module: in_dim=64, out_dim=16, 2 layers.
    batch, in_dim, out_dim, layer_num = 8, 64, 16, 2

    key = jax.random.PRNGKey(0)
    kx, kp = jax.random.split(key)
    x = jax.random.normal(kx, (batch, in_dim), dtype=jnp.float32)
    enc_params, dec_params = init_stackdae_params(kp, in_dim, out_dim, layer_num)

    prepared = prepare_stackdae_params(enc_params, dec_params)  # one-time pad/cast
    out, hidden = stackdae_forward(x, prepared)
    out = jax.block_until_ready(out)
    hidden = jax.block_until_ready(hidden)

    # Correctness check against the pure-JAX reference (same bf16/f32 mix).
    ref_out, ref_hidden = stackdae_reference(x, enc_params, dec_params)
    assert out.shape == (batch, in_dim), out.shape
    assert hidden.shape == (batch, out_dim), hidden.shape
    assert jnp.allclose(out, ref_out, atol=1e-3, rtol=1e-3)
    assert jnp.allclose(hidden, ref_hidden, atol=1e-3, rtol=1e-3)

    print("KERNEL_OK")
</pallas_src>

<mosaic_0001>
module attributes {stable_mosaic.version = 11 : i64} {
  func.func @_stackdae_kernel(%arg0: i32, %arg1: memref<16x128xbf16, #tpu.memory_space<vmem>>, %arg2: memref<128x128xbf16, #tpu.memory_space<vmem>>, %arg3: memref<128x128xbf16, #tpu.memory_space<vmem>>, %arg4: memref<128x128xbf16, #tpu.memory_space<vmem>>, %arg5: memref<128x128xbf16, #tpu.memory_space<vmem>>, %arg6: memref<1x128xf32, #tpu.memory_space<vmem>>, %arg7: memref<1x128xf32, #tpu.memory_space<vmem>>, %arg8: memref<1x128xf32, #tpu.memory_space<vmem>>, %arg9: memref<1x128xf32, #tpu.memory_space<vmem>>, %arg10: memref<16x128xf32, #tpu.memory_space<vmem>>, %arg11: memref<16x128xf32, #tpu.memory_space<vmem>>) attributes {dimension_semantics = [#tpu.dimension_semantics<parallel>], iteration_bounds = array<i64: 1>, scalar_prefetch = 0 : i64, scratch_operands = 0 : i64, tpu.core_type = #tpu.core_type<tc>, window_params = [{transform_indices = @transform_0, window_bounds = array<i64: 16, 128>}, {pipeline_mode = #tpu.pipeline_mode<synchronous>, transform_indices = @transform_1, window_bounds = array<i64: 128, 128>}, {pipeline_mode = #tpu.pipeline_mode<synchronous>, transform_indices = @transform_2, window_bounds = array<i64: 128, 128>}, {pipeline_mode = #tpu.pipeline_mode<synchronous>, transform_indices = @transform_3, window_bounds = array<i64: 128, 128>}, {pipeline_mode = #tpu.pipeline_mode<synchronous>, transform_indices = @transform_4, window_bounds = array<i64: 128, 128>}, {pipeline_mode = #tpu.pipeline_mode<synchronous>, transform_indices = @transform_5, window_bounds = array<i64: 1, 128>}, {pipeline_mode = #tpu.pipeline_mode<synchronous>, transform_indices = @transform_6, window_bounds = array<i64: 1, 128>}, {pipeline_mode = #tpu.pipeline_mode<synchronous>, transform_indices = @transform_7, window_bounds = array<i64: 1, 128>}, {pipeline_mode = #tpu.pipeline_mode<synchronous>, transform_indices = @transform_8, window_bounds = array<i64: 1, 128>}, {transform_indices = @transform_9, window_bounds = array<i64: 16, 128>}, {transform_indices = @transform_10, window_bounds = array<i64: 16, 128>}]} {
    %c0 = arith.constant 0 : index
    %c0_0 = arith.constant 0 : index
    %0 = vector.load %arg1[%c0, %c0_0] : memref<16x128xbf16, #tpu.memory_space<vmem>>, vector<16x128xbf16>
    %c0_1 = arith.constant 0 : index
    %c0_2 = arith.constant 0 : index
    %1 = vector.load %arg2[%c0_1, %c0_2] : memref<128x128xbf16, #tpu.memory_space<vmem>>, vector<128x128xbf16>
    %cst = arith.constant dense<0.000000e+00> : vector<16x128xf32>
    %2 = tpu.matmul %0, %1, %cst {dimension_numbers = #tpu.dot_dimension_numbers<[1], [0], [0], [1], [0, 0, 1, 1], [], []>} : vector<16x128xbf16>, vector<128x128xbf16>, vector<16x128xf32> -> vector<16x128xf32>
    %c0_3 = arith.constant 0 : index
    %c0_4 = arith.constant 0 : index
    %3 = vector.load %arg6[%c0_3, %c0_4] : memref<1x128xf32, #tpu.memory_space<vmem>>, vector<1x128xf32>
    %4 = vector.broadcast %3 : vector<1x128xf32> to vector<16x128xf32>
    %5 = arith.addf %2, %4 : vector<16x128xf32>
    %cst_5 = arith.constant 0.00999999977 : f32
    %6 = vector.broadcast %cst_5 : f32 to vector<16x128xf32>
    %7 = arith.mulf %6, %5 : vector<16x128xf32>
    %8 = arith.maximumf %5, %7 : vector<16x128xf32>
    %9 = arith.truncf %8 : vector<16x128xf32> to vector<16x128xbf16>
    %c0_6 = arith.constant 0 : index
    %c0_7 = arith.constant 0 : index
    %10 = vector.load %arg3[%c0_6, %c0_7] : memref<128x128xbf16, #tpu.memory_space<vmem>>, vector<128x128xbf16>
    %cst_8 = arith.constant dense<0.000000e+00> : vector<16x128xf32>
    %11 = tpu.matmul %9, %10, %cst_8 {dimension_numbers = #tpu.dot_dimension_numbers<[1], [0], [0], [1], [0, 0, 1, 1], [], []>} : vector<16x128xbf16>, vector<128x128xbf16>, vector<16x128xf32> -> vector<16x128xf32>
    %c0_9 = arith.constant 0 : index
    %c0_10 = arith.constant 0 : index
    %12 = vector.load %arg7[%c0_9, %c0_10] : memref<1x128xf32, #tpu.memory_space<vmem>>, vector<1x128xf32>
    %13 = vector.broadcast %12 : vector<1x128xf32> to vector<16x128xf32>
    %14 = arith.addf %11, %13 : vector<16x128xf32>
    %cst_11 = arith.constant 0.00999999977 : f32
    %15 = vector.broadcast %cst_11 : f32 to vector<16x128xf32>
    %16 = arith.mulf %15, %14 : vector<16x128xf32>
    %17 = arith.maximumf %14, %16 : vector<16x128xf32>
    %c0_12 = arith.constant 0 : index
    %c0_13 = arith.constant 0 : index
    %18 = vector.load %arg11[%c0_12, %c0_13] : memref<16x128xf32, #tpu.memory_space<vmem>>, vector<16x128xf32>
    tpu.vector_store %arg11[%c0_12, %c0_13], %17 {strides = array<i32>} : memref<16x128xf32, #tpu.memory_space<vmem>>, vector<16x128xf32>,
    %19 = arith.truncf %17 : vector<16x128xf32> to vector<16x128xbf16>
    %c0_14 = arith.constant 0 : index
    %c0_15 = arith.constant 0 : index
    %20 = vector.load %arg4[%c0_14, %c0_15] : memref<128x128xbf16, #tpu.memory_space<vmem>>, vector<128x128xbf16>
    %cst_16 = arith.constant dense<0.000000e+00> : vector<16x128xf32>
    %21 = tpu.matmul %19, %20, %cst_16 {dimension_numbers = #tpu.dot_dimension_numbers<[1], [0], [0], [1], [0, 0, 1, 1], [], []>} : vector<16x128xbf16>, vector<128x128xbf16>, vector<16x128xf32> -> vector<16x128xf32>
    %c0_17 = arith.constant 0 : index
    %c0_18 = arith.constant 0 : index
    %22 = vector.load %arg8[%c0_17, %c0_18] : memref<1x128xf32, #tpu.memory_space<vmem>>, vector<1x128xf32>
    %23 = vector.broadcast %22 : vector<1x128xf32> to vector<16x128xf32>
    %24 = arith.addf %21, %23 : vector<16x128xf32>
    %25 = arith.truncf %24 : vector<16x128xf32> to vector<16x128xbf16>
    %c0_19 = arith.constant 0 : index
    %c0_20 = arith.constant 0 : index
    %26 = vector.load %arg5[%c0_19, %c0_20] : memref<128x128xbf16, #tpu.memory_space<vmem>>, vector<128x128xbf16>
    %cst_21 = arith.constant dense<0.000000e+00> : vector<16x128xf32>
    %27 = tpu.matmul %25, %26, %cst_21 {dimension_numbers = #tpu.dot_dimension_numbers<[1], [0], [0], [1], [0, 0, 1, 1], [], []>} : vector<16x128xbf16>, vector<128x128xbf16>, vector<16x128xf32> -> vector<16x128xf32>
    %c0_22 = arith.constant 0 : index
    %c0_23 = arith.constant 0 : index
    %28 = vector.load %arg9[%c0_22, %c0_23] : memref<1x128xf32, #tpu.memory_space<vmem>>, vector<1x128xf32>
    %29 = vector.broadcast %28 : vector<1x128xf32> to vector<16x128xf32>
    %30 = arith.addf %27, %29 : vector<16x128xf32>
    %c0_24 = arith.constant 0 : index
    %c0_25 = arith.constant 0 : index
    %31 = vector.load %arg10[%c0_24, %c0_25] : memref<16x128xf32, #tpu.memory_space<vmem>>, vector<16x128xf32>
    tpu.vector_store %arg10[%c0_24, %c0_25], %30 {strides = array<i32>} : memref<16x128xf32, #tpu.memory_space<vmem>>, vector<16x128xf32>,
    return
  }
  func.func @transform_0(%arg0: i32) -> (i32, i32) {
    %c0_i32 = arith.constant 0 : i32
    %c0_i32_0 = arith.constant 0 : i32
    return %arg0, %c0_i32 : i32, i32
  }
  func.func @transform_1(%arg0: i32) -> (i32, i32) {
    %c0_i32 = arith.constant 0 : i32
    %c0_i32_0 = arith.constant 0 : i32
    %c0_i32_1 = arith.constant 0 : i32
    return %c0_i32, %c0_i32_0 : i32, i32
  }
  func.func @transform_2(%arg0: i32) -> (i32, i32) {
    %c0_i32 = arith.constant 0 : i32
    %c0_i32_0 = arith.constant 0 : i32
    %c0_i32_1 = arith.constant 0 : i32
    return %c0_i32, %c0_i32_0 : i32, i32
  }
  func.func @transform_3(%arg0: i32) -> (i32, i32) {
    %c0_i32 = arith.constant 0 : i32
    %c0_i32_0 = arith.constant 0 : i32
    %c0_i32_1 = arith.constant 0 : i32
    return %c0_i32, %c0_i32_0 : i32, i32
  }
  func.func @transform_4(%arg0: i32) -> (i32, i32) {
    %c0_i32 = arith.constant 0 : i32
    %c0_i32_0 = arith.constant 0 : i32
    %c0_i32_1 = arith.constant 0 : i32
    return %c0_i32, %c0_i32_0 : i32, i32
  }
  func.func @transform_5(%arg0: i32) -> (i32, i32) {
    %c0_i32 = arith.constant 0 : i32
    %c0_i32_0 = arith.constant 0 : i32
    %c0_i32_1 = arith.constant 0 : i32
    return %c0_i32, %c0_i32_0 : i32, i32
  }
  func.func @transform_6(%arg0: i32) -> (i32, i32) {
    %c0_i32 = arith.constant 0 : i32
    %c0_i32_0 = arith.constant 0 : i32
    %c0_i32_1 = arith.constant 0 : i32
    return %c0_i32, %c0_i32_0 : i32, i32
  }
  func.func @transform_7(%arg0: i32) -> (i32, i32) {
    %c0_i32 = arith.constant 0 : i32
    %c0_i32_0 = arith.constant 0 : i32
    %c0_i32_1 = arith.constant 0 : i32
    return %c0_i32, %c0_i32_0 : i32, i32
  }
  func.func @transform_8(%arg0: i32) -> (i32, i32) {
    %c0_i32 = arith.constant 0 : i32
    %c0_i32_0 = arith.constant 0 : i32
    %c0_i32_1 = arith.constant 0 : i32
    return %c0_i32, %c0_i32_0 : i32, i32
  }
  func.func @transform_9(%arg0: i32) -> (i32, i32) {
    %c0_i32 = arith.constant 0 : i32
    %c0_i32_0 = arith.constant 0 : i32
    return %arg0, %c0_i32 : i32, i32
  }
  func.func @transform_10(%arg0: i32) -> (i32, i32) {
    %c0_i32 = arith.constant 0 : i32
    %c0_i32_0 = arith.constant 0 : i32
    return %arg0, %c0_i32 : i32, i32
  }
}

</mosaic_0001>

<bundles_post_ra>
// kernel: _stackdae_apply.1
= control target key start
LH: loop header
LB: loop body
LE: loop exit
PB: predicated region body
PF: predicated region fallthrough
CT: control target
= control target key end

     0   :  { %16 = vsyncpa [#allocation3], 0  ;;  %s836_s0 = inlined_call_operand.vmem [shape: bf16[16,128], index: 0, kind: input, shape index: {}]   ;;  %s837_s1 = inlined_call_operand.hbm [shape: bf16[128,128], index: 1, kind: input, shape index: {}]   ;;  %s838_s2 = inlined_call_operand.hbm [shape: bf16[128,128], index: 2, kind: input, shape index: {}]   ;;  %s839_s3 = inlined_call_operand.hbm [shape: bf16[128,128], index: 3, kind: input, shape index: {}]   ;;  %s840_s4 = inlined_call_operand.hbm [shape: bf16[128,128], index: 4, kind: input, shape index: {}]   ;;  %s841_s5 = inlined_call_operand.vmem [shape: f32[1,128], index: 5, kind: input, shape index: {}]   ;;  %s842_s6 = inlined_call_operand.vmem [shape: f32[1,128], index: 6, kind: input, shape index: {}]   ;;  %s843_s7 = inlined_call_operand.vmem [shape: f32[1,128], index: 7, kind: input, shape index: {}]   ;;  %s844_s8 = inlined_call_operand.vmem [shape: f32[1,128], index: 8, kind: input, shape index: {}]   ;;  %s845_s9 = inlined_call_operand.vmem [shape: f32[16,128], index: 9, kind: output, shape index: {0}]   ;;  %s846_s10 = inlined_call_operand.vmem [shape: f32[16,128], index: 10, kind: output, shape index: {1}]  }
   0x1   :  { %17 = vsyncpa [#allocation5], 0 }
   0x2   :  { %18 = vsyncpa [#allocation8], 0  ;;  %s38_s15 = sshll.u32 %s838_s2, 4  ;;  %s736_s16 = smov [#allocation4]   ;;  %s39_s15 = int_to_ptr.hbm [resolvable:$true] %s38_s15 }
   0x3   :  { %s40_s17 = sshll.u32 %s736_s16, 4  ;;  %s25_s20 = sshll.u32 %s837_s1, 4  ;;  %s41_s17 = int_to_ptr.vmem [resolvable:$true] %s40_s17  ;;  %s26_s20 = int_to_ptr.hbm [resolvable:$true] %s25_s20 }
   0x4   :  { %s737_s21 = smov 64   ;;  %s738_s22 = smov 4  }
   0x5   :  { %46 = dma.hbm_to_vmem [thread:$0]  %s39_s15, 1024, %s41_s17, [#allocation5], %s737_s21, %s737_s21, %s738_s22  }
   0x6   :  { %s739_s23 = smov [#allocation2]   ;;  %s51_s27 = sshll.u32 %s839_s3, 4  ;;  %s52_s27 = int_to_ptr.hbm [resolvable:$true] %s51_s27 }
   0x7   :  { %s27_s24 = sshll.u32 %s739_s23, 4  ;;  %s64_s29 = sshll.u32 %s840_s4, 4  ;;  %s28_s24 = int_to_ptr.vmem [resolvable:$true] %s27_s24  ;;  %s65_s29 = int_to_ptr.hbm [resolvable:$true] %s64_s29 }
   0x8   :  { %33 = dma.hbm_to_vmem [thread:$0]  %s26_s20, 1024, %s28_s24, [#allocation3], %s737_s21, %s737_s21, %s738_s22  }
   0x9   :  { %s740_s30 = smov [#allocation6]   ;;  %s741_s1 = smov [#allocation7]  }
   0xa   :  { %s53_s11 = sshll.u32 %s740_s30, 4  ;;  %s66_s12 = sshll.u32 %s741_s1, 4  ;;  %s54_s11 = int_to_ptr.vmem [resolvable:$true] %s53_s11  ;;  %s67_s12 = int_to_ptr.vmem [resolvable:$true] %s66_s12 }
   0xb   :  { %59 = dma.hbm_to_vmem [thread:$0]  %s52_s27, 1024, %s54_s11, [#allocation5], %s737_s21, %s737_s21, %s738_s22  }
   0xc   :  { %72 = dma.hbm_to_vmem [thread:$0]  %s65_s29, 1024, %s67_s12, [#allocation8], %s737_s21, %s737_s21, %s738_s22  }
   0xd   :  { %730 = dma.done.wait [#allocation3], 1024  }
   0xe   :  { %731 = vsyncadd [#allocation3], 4294966272 }
   0xf   :  { %732 = dma.done.wait [#allocation5], 2048  }
  0x10   :  { %733 = vsyncadd [#allocation5], 4294965248 }
  0x11   :  { %734 = dma.done.wait [#allocation8], 1024  }
  0x12   :  { %735 = vsyncadd [#allocation8], 4294966272  ;;  %v599_v0 = vld [vmem:[#allocation2 + $0x38] sm:$0xff]  ;;  %v598_v1 = vld [vmem:[#allocation2 + $0x30] sm:$0xff] }
  0x13   :  { %173 = vmatpush.bf16.msra.mxu0 %v599_v0  ;;  %v607_v2 = vld [vmem:[#allocation4 + $0x38] sm:$0xff]  ;;  %v606_v3 = vld [vmem:[#allocation4 + $0x30] sm:$0xff]  ;;  %v597_v4 = vld [vmem:[#allocation2 + $0x28] sm:$0xff] }
  0x14   :  { %260 = vmatpush.bf16.msra.mxu1 %v607_v2  ;;  %v605_v5 = vld [vmem:[#allocation4 + $0x28] sm:$0xff]  ;;  %v596_v6 = vld [vmem:[#allocation2 + $0x20] sm:$0xff]  ;;  %v595_v8 = vld [vmem:[#allocation2 + $0x18] sm:$0xff] }
  0x15   :  { %v604_v7 = vld [vmem:[#allocation4 + $0x20] sm:$0xff]  ;;  %v594_v9 = vld [vmem:[#allocation2 + $0x10] sm:$0xff]  ;;  %v593_v10 = vld [vmem:[#allocation2 + $0x8] sm:$0xff] }
  0x16   :  { %v592_v11 = vld [vmem:[#allocation2] sm:$0xff]  ;;  %v603_v13 = vld [vmem:[#allocation4 + $0x18] sm:$0xff]  ;;  %v602_v14 = vld [vmem:[#allocation4 + $0x10] sm:$0xff] }
  0x17   :  { %174 = vmatpush.bf16.msra.mxu0 %v598_v1  ;;  %v591_v12 = vld [vmem:[%s836_s0] sm:$0xff]  ;;  %v601_v15 = vld [vmem:[#allocation4 + $0x8] sm:$0xff]  ;;  %v615_v17 = vld [vmem:[#allocation6 + $0x38] sm:$0xff] }
  0x18   :  { %261 = vmatpush.bf16.msra.mxu1 %v606_v3  ;;  %v600_v16 = vld [vmem:[#allocation4] sm:$0xff]  ;;  %349 = vmatpush.bf16.msra.mxu2 %v615_v17  ;;  %v614_v18 = vld [vmem:[#allocation6 + $0x30] sm:$0xff]  ;;  %v613_v19 = vld [vmem:[#allocation6 + $0x28] sm:$0xff] }
  0x19   :  { %v612_v20 = vld [vmem:[#allocation6 + $0x20] sm:$0xff]  ;;  %v611_v31 = vld [vmem:[#allocation6 + $0x18] sm:$0xff]  ;;  %v610_v32 = vld [vmem:[#allocation6 + $0x10] sm:$0xff] }
  0x1a   :  { %v630_v22 = vld [vmem:[%s841_s5] ss:$0 sm:$0xff]  ;;  %v609_v33 = vld [vmem:[#allocation6 + $0x8] sm:$0xff]  ;;  %v623_v35 = vld [vmem:[#allocation7 + $0x38] sm:$0xff] }
  0x1b   :  { %175 = vmatpush.bf16.msra.mxu0 %v597_v4  ;;  %v608_v34 = vld [vmem:[#allocation6] sm:$0xff]  ;;  %432 = vmatpush.bf16.msra.mxu3 %v623_v35  ;;  %v622_v36 = vld [vmem:[#allocation7 + $0x30] sm:$0xff]  ;;  %v621_v37 = vld [vmem:[#allocation7 + $0x28] sm:$0xff] }
  0x1c   :  { %262 = vmatpush.bf16.msra.mxu1 %v605_v5  ;;  %350 = vmatpush.bf16.msra.mxu2 %v614_v18  ;;  %v620_v38 = vld [vmem:[#allocation7 + $0x20] sm:$0xff]  ;;  %v619_v40 = vld [vmem:[#allocation7 + $0x18] sm:$0xff]  ;;  %v618_v50 = vld [vmem:[#allocation7 + $0x10] sm:$0xff] }
  0x1d   :  { %v631_v39 = vld [vmem:[%s842_s6] ss:$0 sm:$0xff]  ;;  %v617_v51 = vld [vmem:[#allocation7 + $0x8] sm:$0xff] }
  0x1e   :  { %v616_v52 = vld [vmem:[#allocation7] sm:$0xff] }
  0x1f   :  { %176 = vmatpush.bf16.msra.mxu0 %v596_v6  ;;  %433 = vmatpush.bf16.msra.mxu3 %v622_v36  ;;  %v632_v54 = vld [vmem:[%s843_s7] ss:$0 sm:$0xff] }
  0x20   :  { %263 = vmatpush.bf16.msra.mxu1 %v604_v7  ;;  %351 = vmatpush.bf16.msra.mxu2 %v613_v19  ;;  %v633_v59 = vld [vmem:[%s844_s8] ss:$0 sm:$0xff] }
  0x23   :  { %177 = vmatpush.bf16.msra.mxu0 %v595_v8  ;;  %434 = vmatpush.bf16.msra.mxu3 %v621_v37 }
  0x24   :  { %264 = vmatpush.bf16.msra.mxu1 %v603_v13  ;;  %352 = vmatpush.bf16.msra.mxu2 %v612_v20 }
  0x27   :  { %178 = vmatpush.bf16.msra.mxu0 %v594_v9  ;;  %435 = vmatpush.bf16.msra.mxu3 %v620_v38 }
  0x28   :  { %265 = vmatpush.bf16.msra.mxu1 %v602_v14  ;;  %353 = vmatpush.bf16.msra.mxu2 %v611_v31 }
  0x2b   :  { %179 = vmatpush.bf16.msra.mxu0 %v593_v10  ;;  %436 = vmatpush.bf16.msra.mxu3 %v619_v40 }
  0x2c   :  { %266 = vmatpush.bf16.msra.mxu1 %v601_v15  ;;  %354 = vmatpush.bf16.msra.mxu2 %v610_v32 }
  0x2f   :  { %180 = vmatpush.bf16.msra.mxu0 %v592_v11  ;;  %437 = vmatpush.bf16.msra.mxu3 %v618_v50 }
  0x30   :  { %267 = vmatpush.bf16.msra.mxu1 %v600_v16  ;;  %355 = vmatpush.bf16.msra.mxu2 %v609_v33 }
  0x32   :  { %181 = vmatmul.bf16.vlgmr.msra.gmra.mxu0 %v591_v12 }
  0x33   :  { %438 = vmatpush.bf16.msra.mxu3 %v617_v51 }
  0x34   :  { %356 = vmatpush.bf16.msra.mxu2 %v608_v34 }
  0x37   :  { %439 = vmatpush.bf16.msra.mxu3 %v616_v52 }
  0xaf   :  { %v182_v21 = vpop.f32.mrf.mxu0 }
  0xb0   :  { %v183_v23 = vadd.f32 %v630_v22, %v182_v21 }
  0xb2   :  { %v187_v25 = vmul.f32 0.01, %v183_v23 }
  0xb4   :  { %v189_v28 = vmax.f32 %v183_v23, %v187_v25 }
  0xb7   :  { %v184_v24 = vpop.f32.mrf.mxu0 }
  0xb8   :  { %v185_v26 = vadd.f32 %v630_v22, %v184_v24 }
  0xba   :  { %v188_v27 = vmul.f32 0.01, %v185_v26 }
  0xbc   :  { %v190_v29 = vmax.f32 %v185_v26, %v188_v27 }
  0xbe   :  { %v191_v30 = vpack.c.bf16 %v190_v29, %v189_v28 }
  0xc0   :  { %268 = vmatmul.bf16.vlgmr.msra.gmra.mxu1 %v191_v30 }
 0x13d   :  { %v269_v41 = vpop.f32.mrf.mxu1 }
 0x13e   :  { %v270_v42 = vadd.f32 %v631_v39, %v269_v41 }
 0x140   :  { %v274_v43 = vmul.f32 0.01, %v270_v42 }
 0x142   :  { %v276_v44 = vmax.f32 %v270_v42, %v274_v43 }
 0x144   :  { %278 = vst [vmem:[%s846_s10] sm:$0xff] %v276_v44 }
 0x145   :  { %v271_v45 = vpop.f32.mrf.mxu1 }
 0x146   :  { %v272_v46 = vadd.f32 %v631_v39, %v271_v45 }
 0x148   :  { %v275_v47 = vmul.f32 0.01, %v272_v46 }
 0x14a   :  { %v277_v48 = vmax.f32 %v272_v46, %v275_v47 }
 0x14c   :  { %279 = vst [vmem:[%s846_s10 + $0x8] sm:$0xff] %v277_v48  ;;  %v280_v49 = vpack.c.bf16 %v277_v48, %v276_v44 }
 0x14e   :  { %357 = vmatmul.bf16.vlgmr.msra.gmra.mxu2 %v280_v49 }
 0x1d1   :  { %v358_v53 = vpop.f32.mrf.mxu2 }
 0x1d2   :  { %v359_v56 = vadd.f32 %v632_v54, %v358_v53 }
 0x1d9   :  { %v360_v55 = vpop.f32.mrf.mxu2 }
 0x1da   :  { %v361_v57 = vadd.f32 %v632_v54, %v360_v55 }
 0x1dc   :  { %v363_v58 = vpack.c.bf16 %v361_v57, %v359_v56 }
 0x1de   :  { %440 = vmatmul.bf16.vlgmr.msra.gmra.mxu3 %v363_v58 }
 0x261   :  { %v441_v60 = vpop.f32.mrf.mxu3 }
 0x262   :  { %v442_v61 = vadd.f32 %v633_v59, %v441_v60 }
 0x264   :  { %446 = vst [vmem:[%s845_s9] sm:$0xff] %v442_v61 }
 0x269   :  { %v443_v62 = vpop.f32.mrf.mxu3 }
 0x26a   :  { %v444_v63 = vadd.f32 %v633_v59, %v443_v62 }
 0x26c   :  { %447 = vst [vmem:[%s845_s9 + $0x8] sm:$0xff] %v444_v63 }
 0x26d   :  { %456 = vsyncpa [#allocation3], 1 }
 0x26e   :  { %457 = vsyncpa [#allocation5], 1 }
 0x26f   :  { %458 = vsyncpa [#allocation8], 1 }

</bundles_post_ra>
